<compile_context>
chip_gen: v6e
topology: v6e:2x2x1
jax: 0.10.0
libtpu: 0.0.40
codegen_flags: <defaults>
</compile_context>

<pallas_src>
import math

import numpy as np
import jax
import jax.numpy as jnp
from jax.experimental import pallas as pl
from jax.experimental.pallas import tpu as pltpu


# ----------------------------------------------------------------------------
# Small helpers
# ----------------------------------------------------------------------------
def _round_up(x, m):
    return ((x + m - 1) // m) * m


def _pick_tile(dim, candidates=(512, 256, 128)):
    """dim is a multiple of 128; pick the largest candidate that divides it."""
    for t in candidates:
        if dim % t == 0:
            return t
    return dim


# ----------------------------------------------------------------------------
# Kernel rotation (replaces rotation.MultiRotationOperatorMatrixSparse).
# Dense bilinear-interpolation rotation with zero padding and a spatial disk
# mask; an approximation of the original sparse rotation-operator matrix.
# ----------------------------------------------------------------------------
def _bilinear_rotate(kernel, theta, disk_mask=True):
    """Rotate a [Cout, Cin, k, k] kernel spatially by angle `theta`."""
    Cout, Cin, k, _ = kernel.shape
    c = (k - 1) / 2.0
    ys, xs = jnp.meshgrid(
        jnp.arange(k, dtype=jnp.float32),
        jnp.arange(k, dtype=jnp.float32),
        indexing="ij",
    )
    ct = jnp.cos(theta)
    st = jnp.sin(theta)
    # Inverse-rotate the output grid to get source sampling coordinates.
    y_src = ct * (ys - c) + st * (xs - c) + c
    x_src = -st * (ys - c) + ct * (xs - c) + c

    y0 = jnp.floor(y_src)
    x0 = jnp.floor(x_src)
    y1 = y0 + 1.0
    x1 = x0 + 1.0
    wy1 = y_src - y0
    wy0 = 1.0 - wy1
    wx1 = x_src - x0
    wx0 = 1.0 - wx1

    def gather(yi, xi, w):
        inb = (yi >= 0) & (yi < k) & (xi >= 0) & (xi < k)
        yc = jnp.clip(yi, 0, k - 1).astype(jnp.int32)
        xc = jnp.clip(xi, 0, k - 1).astype(jnp.int32)
        vals = kernel[:, :, yc, xc]  # [Cout, Cin, k, k]
        return vals * (w * inb.astype(jnp.float32))[None, None]

    rot = (
        gather(y0, x0, wy0 * wx0)
        + gather(y0, x1, wy0 * wx1)
        + gather(y1, x0, wy1 * wx0)
        + gather(y1, x1, wy1 * wx1)
    )
    if disk_mask:
        mask = ((ys - c) ** 2 + (xs - c) ** 2) <= (c + 1e-3) ** 2
        rot = rot * mask.astype(jnp.float32)[None, None]
    return rot


def rotate_lifting_kernels(kernel, orientations_nb, periodicity=2.0 * np.pi,
                           disk_mask=True):
    """[Cout, Cin, k, k] -> [Ntheta, Cout, Cin, k, k]."""
    rots = [
        _bilinear_rotate(kernel, float(periodicity) * i / orientations_nb, disk_mask)
        for i in range(orientations_nb)
    ]
    return jnp.stack(rots, axis=0)


# ----------------------------------------------------------------------------
# Pallas GEMM kernel: the conv hot path (bf16 operands, f32 accumulation).
# ----------------------------------------------------------------------------
def _gemm_kernel(a_ref, b_ref, o_ref, acc_ref):
    # a_ref: [tm, tk] bf16, b_ref: [tk, tn] bf16, o_ref: [tm, tn] f32
    @pl.when(pl.program_id(2) == 0)
    def _init():
        acc_ref[...] = jnp.zeros_like(acc_ref)

    acc_ref[...] += jnp.dot(a_ref[...], b_ref[...],
                            preferred_element_type=jnp.float32)

    @pl.when(pl.program_id(2) == pl.num_programs(2) - 1)
    def _store():
        o_ref[...] = acc_ref[...].astype(o_ref.dtype)


def pallas_gemm(a, b, *, out_dtype=jnp.float32, tm_max=512):
    """Compute a @ b with a Pallas TPU kernel.

    a: [M, K], b: [K, N]; K and N must be multiples of 128 (caller zero-pads).
    M may be ragged (last row tile is handled by Pallas).
    """
    M, K = a.shape
    K2, N = b.shape
    assert K == K2
    assert K % 128 == 0 and N % 128 == 0

    tm = min(tm_max, _round_up(M, 8))
    tn = _pick_tile(N)
    tk = _pick_tile(K)
    grid = (pl.cdiv(M, tm), N // tn, K // tk)

    in_bytes = jnp.dtype(a.dtype).itemsize
    out_bytes = jnp.dtype(out_dtype).itemsize
    cost = pl.CostEstimate(
        flops=2 * M * K * N,
        transcendentals=0,
        bytes_accessed=(M * K + K * N) * in_bytes + M * N * out_bytes,
    )

    return pl.pallas_call(
        _gemm_kernel,
        out_shape=jax.ShapeDtypeStruct((M, N), out_dtype),
        grid_spec=pltpu.PrefetchScalarGridSpec(
            num_scalar_prefetch=0,
            grid=grid,
            in_specs=[
                pl.BlockSpec((tm, tk), lambda i, j, kk: (i, kk)),   # patches tile
                pl.BlockSpec((tk, tn), lambda i, j, kk: (kk, j)),   # weight tile
            ],
            out_specs=pl.BlockSpec((tm, tn), lambda i, j, kk: (i, j)),
            scratch_shapes=[pltpu.VMEM((tm, tn), jnp.float32)],
        ),
        compiler_params=pltpu.CompilerParams(
            dimension_semantics=("parallel", "parallel", "arbitrary"),
        ),
        cost_estimate=cost,
    )(a, b)


# ----------------------------------------------------------------------------
# NN_z2_se2n forward pass.
# ----------------------------------------------------------------------------
def nn_z2_se2n_forward(x, kernel, Ntheta, stride=1):
    """x: [B, Cin, H, W] NCHW; kernel: [Cout, Cin, k, k].
    Returns [B, Ntheta, Cout, Hout, Wout] ('valid' conv)."""
    B, Cin, H, W = x.shape
    Cout, _, k, _ = kernel.shape
    Hout = (H - k) // stride + 1
    Wout = (W - k) // stride + 1
    K = Cin * k * k
    N = Ntheta * Cout
    Kp = _round_up(K, 128)
    Np = _round_up(N, 128)
    M = B * Hout * Wout

    # Rotated kernel stack -> GEMM weight matrix. Row order (dy, dx, cin),
    # column order (theta, cout). All layout reordering + padding happens on
    # this tiny [K, N] matrix, not on the big activation side.
    kstack = rotate_lifting_kernels(kernel, Ntheta)            # [Nt,Cout,Cin,k,k]
    w_mat = kstack.transpose(3, 4, 2, 0, 1).reshape(K, N)      # [k*k*Cin, Nt*Cout]
    w_mat = jnp.pad(w_mat, ((0, Kp - K), (0, Np - N))).astype(jnp.bfloat16)

    # im2col in NHWC: single concat along the lane axis; zero K-padding folded
    # into the concat (no separate jnp.pad pass over the patches matrix).
    x_nhwc = jnp.transpose(x, (0, 2, 3, 1)).astype(jnp.bfloat16)   # [B,H,W,Cin]
    cols = []
    for dy in range(k):
        for dx in range(k):
            cols.append(
                x_nhwc[:, dy:dy + Hout * stride:stride,
                          dx:dx + Wout * stride:stride, :]
            )
    if Kp > K:
        cols.append(jnp.zeros((B, Hout, Wout, Kp - K), dtype=jnp.bfloat16))
    patches = jnp.concatenate(cols, axis=-1).reshape(M, Kp)        # [M, Kp]

    # Hot path: MXU GEMM (bf16 operands, f32 accumulation).
    out = pallas_gemm(patches, w_mat, out_dtype=jnp.float32)       # [M, Np]

    out = out[:, :N].reshape(B, Hout, Wout, Ntheta, Cout)
    out = out.transpose(0, 3, 4, 1, 2)                             # [B,Nt,Cout,Ho,Wo]
    return out


class NNZ2SE2N:
    """JAX/Pallas equivalent of the PyTorch NN_z2_se2n module (forward only)."""

    def __init__(self, in_c, out_c, kernel_size, Ntheta, stride=1, key=None):
        self.Ntheta = Ntheta
        self.stride = stride
        scale = math.sqrt(2.0 / (in_c * kernel_size * kernel_size))
        self.kernel = (
            jax.random.normal(key, (out_c, in_c, kernel_size, kernel_size),
                              dtype=jnp.float32) * scale
        )

    def __call__(self, x):
        return nn_z2_se2n_forward(x, self.kernel, self.Ntheta, self.stride)


if __name__ == "__main__":
    key = jax.random.PRNGKey(0)
    kx, kw = jax.random.split(key)

    B, Cin, H, W = 2, 4, 16, 16
    out_c, ksz, Ntheta = 8, 5, 8

    x = jax.random.normal(kx, (B, Cin, H, W), dtype=jnp.float32)
    layer = NNZ2SE2N(Cin, out_c, ksz, Ntheta, stride=1, key=kw)

    fwd = jax.jit(lambda inp: layer(inp))
    out = jax.block_until_ready(fwd(x))

    Hout = H - ksz + 1
    Wout = W - ksz + 1
    assert out.shape == (B, Ntheta, out_c, Hout, Wout), out.shape

    # Reference: plain-JAX conv with the same rotated bf16 kernel stack and
    # f32 accumulation (matches the bf16-operand / f32-accumulate GEMM path).
    kstack = rotate_lifting_kernels(layer.kernel, Ntheta)
    w2d = kstack.reshape(Ntheta * out_c, Cin, ksz, ksz).astype(jnp.bfloat16)
    ref = jax.lax.conv_general_dilated(
        x.astype(jnp.bfloat16), w2d, window_strides=(1, 1), padding="VALID",
        dimension_numbers=("NCHW", "OIHW", "NCHW"),
        preferred_element_type=jnp.float32,
    ).reshape(B, Ntheta, out_c, Hout, Wout)
    if not np.allclose(np.asarray(out), np.asarray(ref), rtol=2e-2, atol=2e-2):
        raise AssertionError("Pallas lifting conv does not match JAX reference")

    print("KERNEL_OK")
</pallas_src>

<mosaic_0001>
module attributes {stable_mosaic.version = 11 : i64} {
  func.func @_gemm_kernel(%arg0: i32, %arg1: i32, %arg2: i32, %arg3: memref<288x128xbf16, #tpu.memory_space<vmem>>, %arg4: memref<128x128xbf16, #tpu.memory_space<vmem>>, %arg5: memref<288x128xf32, #tpu.memory_space<vmem>>, %arg6: memref<288x128xf32, #tpu.memory_space<vmem>>) attributes {dimension_semantics = [#tpu.dimension_semantics<parallel>, #tpu.dimension_semantics<parallel>, #tpu.dimension_semantics<arbitrary>], iteration_bounds = array<i64: 1, 1, 1>, scalar_prefetch = 0 : i64, scratch_operands = 1 : i64, tpu.core_type = #tpu.core_type<tc>, window_params = [{transform_indices = @transform_0, window_bounds = array<i64: 288, 128>}, {transform_indices = @transform_1, window_bounds = array<i64: 128, 128>}, {transform_indices = @transform_2, window_bounds = array<i64: 288, 128>}]} {
    %c0_i32 = arith.constant 0 : i32
    %0 = arith.cmpi eq, %arg2, %c0_i32 : i32
    %1 = arith.extui %0 : i1 to i32
    %c0_i32_0 = arith.constant 0 : i32
    %2 = arith.cmpi ne, %1, %c0_i32_0 : i32
    scf.if %2 {
      %cst_10 = arith.constant 0.000000e+00 : f32
      %12 = vector.broadcast %cst_10 : f32 to vector<288x128xf32>
      %c0_11 = arith.constant 0 : index
      %c0_12 = arith.constant 0 : index
      %13 = vector.load %arg6[%c0_11, %c0_12] : memref<288x128xf32, #tpu.memory_space<vmem>>, vector<288x128xf32>
      tpu.vector_store %arg6[%c0_11, %c0_12], %12 {strides = array<i32>} : memref<288x128xf32, #tpu.memory_space<vmem>>, vector<288x128xf32>,
    } else {
    }
    %c0 = arith.constant 0 : index
    %c0_1 = arith.constant 0 : index
    %3 = vector.load %arg6[%c0, %c0_1] : memref<288x128xf32, #tpu.memory_space<vmem>>, vector<288x128xf32>
    %c0_2 = arith.constant 0 : index
    %c0_3 = arith.constant 0 : index
    %4 = vector.load %arg3[%c0_2, %c0_3] : memref<288x128xbf16, #tpu.memory_space<vmem>>, vector<288x128xbf16>
    %c0_4 = arith.constant 0 : index
    %c0_5 = arith.constant 0 : index
    %5 = vector.load %arg4[%c0_4, %c0_5] : memref<128x128xbf16, #tpu.memory_space<vmem>>, vector<128x128xbf16>
    %cst = arith.constant dense<0.000000e+00> : vector<288x128xf32>
    %6 = tpu.matmul %4, %5, %cst {dimension_numbers = #tpu.dot_dimension_numbers<[1], [0], [0], [1], [0, 0, 1, 1], [], []>} : vector<288x128xbf16>, vector<128x128xbf16>, vector<288x128xf32> -> vector<288x128xf32>
    %7 = arith.addf %3, %6 : vector<288x128xf32>
    %c0_6 = arith.constant 0 : index
    %c0_7 = arith.constant 0 : index
    %8 = vector.load %arg6[%c0_6, %c0_7] : memref<288x128xf32, #tpu.memory_space<vmem>>, vector<288x128xf32>
    tpu.vector_store %arg6[%c0_6, %c0_7], %7 {strides = array<i32>} : memref<288x128xf32, #tpu.memory_space<vmem>>, vector<288x128xf32>,
    %c0_i32_8 = arith.constant 0 : i32
    %9 = arith.cmpi eq, %arg2, %c0_i32_8 : i32
    %10 = arith.extui %9 : i1 to i32
    %c0_i32_9 = arith.constant 0 : i32
    %11 = arith.cmpi ne, %10, %c0_i32_9 : i32
    scf.if %11 {
      %c0_10 = arith.constant 0 : index
      %c0_11 = arith.constant 0 : index
      %12 = vector.load %arg6[%c0_10, %c0_11] : memref<288x128xf32, #tpu.memory_space<vmem>>, vector<288x128xf32>
      %c0_12 = arith.constant 0 : index
      %c0_13 = arith.constant 0 : index
      %13 = vector.load %arg5[%c0_12, %c0_13] : memref<288x128xf32, #tpu.memory_space<vmem>>, vector<288x128xf32>
      tpu.vector_store %arg5[%c0_12, %c0_13], %12 {strides = array<i32>} : memref<288x128xf32, #tpu.memory_space<vmem>>, vector<288x128xf32>,
    } else {
    }
    return
  }
  func.func @transform_0(%arg0: i32, %arg1: i32, %arg2: i32) -> (i32, i32) {
    %c0_i32 = arith.constant 0 : i32
    return %arg0, %arg2 : i32, i32
  }
  func.func @transform_1(%arg0: i32, %arg1: i32, %arg2: i32) -> (i32, i32) {
    %c0_i32 = arith.constant 0 : i32
    return %arg2, %arg1 : i32, i32
  }
  func.func @transform_2(%arg0: i32, %arg1: i32, %arg2: i32) -> (i32, i32) {
    %c0_i32 = arith.constant 0 : i32
    return %arg0, %arg1 : i32, i32
  }
}

</mosaic_0001>

<bundles_post_ra>
// kernel: _lambda_.1
= control target key start
LH: loop header
LB: loop body
LE: loop exit
PB: predicated region body
PF: predicated region fallthrough
CT: control target
= control target key end

     0   :  { %s971_s1 = inlined_call_operand.vmem [shape: bf16[128,128], index: 1, kind: input, shape index: {}]   ;;  %s972_s0 = inlined_call_operand.vmem [shape: bf16[288,128], index: 0, kind: input, shape index: {}]   ;;  %s973_s2 = inlined_call_operand.vmem [shape: f32[288,128], index: 2, kind: output, shape index: {}]  }
   0x1   :  { %v744_v0 = vld [vmem:[%s971_s1 + $0x38] sm:$0xff]   ;;  %v745_v1 = vld [vmem:[%s971_s1 + $0x30] sm:$0xff]   ;;  %v746_v2 = vld [vmem:[%s971_s1 + $0x28] sm:$0xff]  }
   0x2   :  { %676 = vmatprep.subr.bf16.mxu0 %v744_v0  ;;  %728 = vmatprep.subr.bf16.mxu1 %v744_v0  ;;  %v747_v3 = vld [vmem:[%s971_s1 + $0x20] sm:$0xff]   ;;  %v754_v5 = vld [vmem:[%s972_s0 + $0x50] sm:$0xff]   ;;  %v748_v6 = vld [vmem:[%s971_s1 + $0x18] sm:$0xff]  }
   0x3   :  { %677 = vmatpush3.bf16.msra.mxu0 %v744_v0  ;;  %736 = vmatpush3.bf16.msra.mxu1 %v744_v0  ;;  %v752_v4 = vld [vmem:[%s972_s0] sm:$0xff]   ;;  %v749_v7 = vld [vmem:[%s971_s1 + $0x10] sm:$0xff]   ;;  %v750_v8 = vld [vmem:[%s971_s1 + $0x8] sm:$0xff]  }
   0x4   :  { %678 = vmatprep.subr.bf16.mxu0 %v745_v1  ;;  %729 = vmatprep.subr.bf16.mxu1 %v745_v1  ;;  %v751_v9 = vld [vmem:[%s971_s1] sm:$0xff]   ;;  %v753_v10 = vld [vmem:[%s972_s0 + $0x8] sm:$0xff]   ;;  %v755_v11 = vld [vmem:[%s972_s0 + $0x58] sm:$0xff]  }
   0x5   :  { %692 = vmatprep.mubr.bf16.mxu0 %v752_v4  ;;  %712 = vmatprep.mubr.bf16.mxu1 %v754_v5  ;;  %v756_v12 = vld [vmem:[%s972_s0 + $0x10] sm:$0xff]   ;;  %v758_v13 = vld [vmem:[%s972_s0 + $0x60] sm:$0xff]   ;;  %v757_v14 = vld [vmem:[%s972_s0 + $0x18] sm:$0xff]  }
   0x6   :  { %v759_v15 = vld [vmem:[%s972_s0 + $0x68] sm:$0xff]   ;;  %v760_v16 = vld [vmem:[%s972_s0 + $0x20] sm:$0xff]   ;;  %v762_v17 = vld [vmem:[%s972_s0 + $0x70] sm:$0xff]  }
   0x7   :  { %679 = vmatpush3.bf16.msra.mxu0 %v745_v1  ;;  %737 = vmatpush3.bf16.msra.mxu1 %v745_v1  ;;  %v761_v18 = vld [vmem:[%s972_s0 + $0x28] sm:$0xff]   ;;  %v763_v19 = vld [vmem:[%s972_s0 + $0x78] sm:$0xff]   ;;  %v764_v20 = vld [vmem:[%s972_s0 + $0x30] sm:$0xff]  }
   0x8   :  { %680 = vmatprep.subr.bf16.mxu0 %v746_v2  ;;  %730 = vmatprep.subr.bf16.mxu1 %v746_v2  ;;  %v766_v21 = vld [vmem:[%s972_s0 + $0x80] sm:$0xff]   ;;  %v765_v22 = vld [vmem:[%s972_s0 + $0x38] sm:$0xff]   ;;  %v767_v23 = vld [vmem:[%s972_s0 + $0x88] sm:$0xff]  }
   0x9   :  { %v768_v24 = vld [vmem:[%s972_s0 + $0x40] sm:$0xff]   ;;  %v769_v25 = vld [vmem:[%s972_s0 + $0x48] sm:$0xff]  }
   0xb   :  { %681 = vmatpush3.bf16.msra.mxu0 %v746_v2  ;;  %738 = vmatpush3.bf16.msra.mxu1 %v746_v2 }
   0xc   :  { %682 = vmatprep.subr.bf16.mxu0 %v747_v3  ;;  %731 = vmatprep.subr.bf16.mxu1 %v747_v3 }
   0xf   :  { %683 = vmatpush3.bf16.msra.mxu0 %v747_v3  ;;  %739 = vmatpush3.bf16.msra.mxu1 %v747_v3 }
  0x10   :  { %684 = vmatprep.subr.bf16.mxu0 %v748_v6  ;;  %732 = vmatprep.subr.bf16.mxu1 %v748_v6 }
  0x13   :  { %685 = vmatpush3.bf16.msra.mxu0 %v748_v6  ;;  %740 = vmatpush3.bf16.msra.mxu1 %v748_v6 }
  0x14   :  { %686 = vmatprep.subr.bf16.mxu0 %v749_v7  ;;  %733 = vmatprep.subr.bf16.mxu1 %v749_v7 }
  0x17   :  { %687 = vmatpush3.bf16.msra.mxu0 %v749_v7  ;;  %741 = vmatpush3.bf16.msra.mxu1 %v749_v7 }
  0x18   :  { %688 = vmatprep.subr.bf16.mxu0 %v750_v8  ;;  %734 = vmatprep.subr.bf16.mxu1 %v750_v8 }
  0x1b   :  { %689 = vmatpush3.bf16.msra.mxu0 %v750_v8  ;;  %742 = vmatpush3.bf16.msra.mxu1 %v750_v8 }
  0x1c   :  { %690 = vmatprep.subr.bf16.mxu0 %v751_v9  ;;  %735 = vmatprep.subr.bf16.mxu1 %v751_v9 }
  0x1f   :  { %691 = vmatpush3.bf16.msra.mxu0 %v751_v9  ;;  %743 = vmatpush3.bf16.msra.mxu1 %v751_v9 }
  0x22   :  { %693 = vmatmul.mubr.bf16.vlgmr.msra.gmra.mxu0 %v753_v10  ;;  %713 = vmatmul.mubr.bf16.vlgmr.msra.gmra.mxu1 %v755_v11 }
  0x23   :  { %696 = vmatprep.mubr.bf16.mxu0 %v756_v12  ;;  %716 = vmatprep.mubr.bf16.mxu1 %v758_v13 }
  0x2a   :  { %697 = vmatmul.mubr.bf16.gmra.mxu0 %v757_v14  ;;  %717 = vmatmul.mubr.bf16.gmra.mxu1 %v759_v15 }
  0x2b   :  { %700 = vmatprep.mubr.bf16.mxu0 %v760_v16  ;;  %720 = vmatprep.mubr.bf16.mxu1 %v762_v17 }
  0x32   :  { %701 = vmatmul.mubr.bf16.gmra.mxu0 %v761_v18  ;;  %721 = vmatmul.mubr.bf16.gmra.mxu1 %v763_v19 }
  0x33   :  { %704 = vmatprep.mubr.bf16.mxu0 %v764_v20  ;;  %724 = vmatprep.mubr.bf16.mxu1 %v766_v21 }
  0x3a   :  { %705 = vmatmul.mubr.bf16.gmra.mxu0 %v765_v22  ;;  %725 = vmatmul.mubr.bf16.gmra.mxu1 %v767_v23 }
  0x3b   :  { %708 = vmatprep.mubr.bf16.mxu0 %v768_v24 }
  0x42   :  { %709 = vmatmul.mubr.bf16.gmra.mxu0 %v769_v25 }
  0xe2   :  { %v694_v26 = vpop.f32.mrf.mxu0  ;;  %v714_v27 = vpop.f32.mrf.mxu1 }
  0xe3   :  { %586 = vst [vmem:[%s973_s2 + $0x10] sm:$0xff] %v694_v26  ;;  %606 = vst [vmem:[%s973_s2 + $0xb0] sm:$0xff] %v714_v27 }
  0xe4   :  { %v330_v28 = vpop.f32.mrf.mxu0  ;;  %v410_v29 = vpop.f32.mrf.mxu1 }
  0xe5   :  { %584 = vst [vmem:[%s973_s2] sm:$0xff] %v330_v28  ;;  %604 = vst [vmem:[%s973_s2 + $0xa0] sm:$0xff] %v410_v29 }
  0xe6   :  { %v695_v30 = vpop.f32.mrf.mxu0  ;;  %v715_v31 = vpop.f32.mrf.mxu1 }
  0xe7   :  { %587 = vst [vmem:[%s973_s2 + $0x18] sm:$0xff] %v695_v30  ;;  %607 = vst [vmem:[%s973_s2 + $0xb8] sm:$0xff] %v715_v31 }
  0xe8   :  { %v333_v32 = vpop.f32.mrf.mxu0  ;;  %v413_v33 = vpop.f32.mrf.mxu1 }
  0xe9   :  { %585 = vst [vmem:[%s973_s2 + $0x8] sm:$0xff] %v333_v32  ;;  %605 = vst [vmem:[%s973_s2 + $0xa8] sm:$0xff] %v413_v33 }
  0xea   :  { %v698_v34 = vpop.f32.mrf.mxu0  ;;  %v718_v35 = vpop.f32.mrf.mxu1 }
  0xeb   :  { %590 = vst [vmem:[%s973_s2 + $0x30] sm:$0xff] %v698_v34  ;;  %610 = vst [vmem:[%s973_s2 + $0xd0] sm:$0xff] %v718_v35 }
  0xec   :  { %v346_v36 = vpop.f32.mrf.mxu0  ;;  %v426_v37 = vpop.f32.mrf.mxu1 }
  0xed   :  { %588 = vst [vmem:[%s973_s2 + $0x20] sm:$0xff] %v346_v36  ;;  %608 = vst [vmem:[%s973_s2 + $0xc0] sm:$0xff] %v426_v37 }
  0xee   :  { %v699_v38 = vpop.f32.mrf.mxu0  ;;  %v719_v39 = vpop.f32.mrf.mxu1 }
  0xef   :  { %591 = vst [vmem:[%s973_s2 + $0x38] sm:$0xff] %v699_v38  ;;  %611 = vst [vmem:[%s973_s2 + $0xd8] sm:$0xff] %v719_v39 }
  0xf0   :  { %v349_v40 = vpop.f32.mrf.mxu0  ;;  %v429_v41 = vpop.f32.mrf.mxu1 }
  0xf1   :  { %589 = vst [vmem:[%s973_s2 + $0x28] sm:$0xff] %v349_v40  ;;  %609 = vst [vmem:[%s973_s2 + $0xc8] sm:$0xff] %v429_v41 }
  0xf2   :  { %v702_v42 = vpop.f32.mrf.mxu0  ;;  %v722_v43 = vpop.f32.mrf.mxu1 }
  0xf3   :  { %594 = vst [vmem:[%s973_s2 + $0x50] sm:$0xff] %v702_v42  ;;  %614 = vst [vmem:[%s973_s2 + $0xf0] sm:$0xff] %v722_v43 }
  0xf4   :  { %v362_v44 = vpop.f32.mrf.mxu0  ;;  %v442_v45 = vpop.f32.mrf.mxu1 }
  0xf5   :  { %592 = vst [vmem:[%s973_s2 + $0x40] sm:$0xff] %v362_v44  ;;  %612 = vst [vmem:[%s973_s2 + $0xe0] sm:$0xff] %v442_v45 }
  0xf6   :  { %v703_v46 = vpop.f32.mrf.mxu0  ;;  %v723_v47 = vpop.f32.mrf.mxu1 }
  0xf7   :  { %595 = vst [vmem:[%s973_s2 + $0x58] sm:$0xff] %v703_v46  ;;  %615 = vst [vmem:[%s973_s2 + $0xf8] sm:$0xff] %v723_v47 }
  0xf8   :  { %v365_v48 = vpop.f32.mrf.mxu0  ;;  %v445_v49 = vpop.f32.mrf.mxu1 }
  0xf9   :  { %593 = vst [vmem:[%s973_s2 + $0x48] sm:$0xff] %v365_v48  ;;  %613 = vst [vmem:[%s973_s2 + $0xe8] sm:$0xff] %v445_v49 }
  0xfa   :  { %v706_v50 = vpop.f32.mrf.mxu0  ;;  %v726_v51 = vpop.f32.mrf.mxu1 }
  0xfb   :  { %598 = vst [vmem:[%s973_s2 + $0x70] sm:$0xff] %v706_v50  ;;  %618 = vst [vmem:[%s973_s2 + $0x110] sm:$0xff] %v726_v51 }
  0xfc   :  { %v378_v52 = vpop.f32.mrf.mxu0  ;;  %v458_v53 = vpop.f32.mrf.mxu1 }
  0xfd   :  { %596 = vst [vmem:[%s973_s2 + $0x60] sm:$0xff] %v378_v52  ;;  %616 = vst [vmem:[%s973_s2 + $0x100] sm:$0xff] %v458_v53 }
  0xfe   :  { %v707_v54 = vpop.f32.mrf.mxu0  ;;  %v727_v55 = vpop.f32.mrf.mxu1 }
  0xff   :  { %599 = vst [vmem:[%s973_s2 + $0x78] sm:$0xff] %v707_v54  ;;  %619 = vst [vmem:[%s973_s2 + $0x118] sm:$0xff] %v727_v55 }
 0x100   :  { %v381_v56 = vpop.f32.mrf.mxu0  ;;  %v461_v57 = vpop.f32.mrf.mxu1 }
 0x101   :  { %597 = vst [vmem:[%s973_s2 + $0x68] sm:$0xff] %v381_v56  ;;  %617 = vst [vmem:[%s973_s2 + $0x108] sm:$0xff] %v461_v57 }
 0x102   :  { %v710_v58 = vpop.f32.mrf.mxu0 }
 0x103   :  { %602 = vst [vmem:[%s973_s2 + $0x90] sm:$0xff] %v710_v58 }
 0x104   :  { %v394_v59 = vpop.f32.mrf.mxu0 }
 0x105   :  { %600 = vst [vmem:[%s973_s2 + $0x80] sm:$0xff] %v394_v59 }
 0x106   :  { %v711_v60 = vpop.f32.mrf.mxu0 }
 0x107   :  { %603 = vst [vmem:[%s973_s2 + $0x98] sm:$0xff] %v711_v60 }
 0x108   :  { %v397_v61 = vpop.f32.mrf.mxu0 }
 0x109   :  { %601 = vst [vmem:[%s973_s2 + $0x88] sm:$0xff] %v397_v61 }

</bundles_post_ra>
